<compile_context>
chip_gen: v7x
topology: tpu7x:2x2x1
jax: 0.10.0
libtpu: 0.0.40
codegen_flags: <defaults>
</compile_context>

<pallas_src>
import jax
import jax.numpy as jnp
from jax import lax
from jax.experimental import pallas as pl
from jax.experimental.pallas import tpu as pltpu

LANES = 128  # vreg lane width


def _round_up(v, m):
    return ((v + m - 1) // m) * m


def simple_model_forward(x, params, *, block_rows=16384, stream_dtype=jnp.bfloat16):
    """Fused MLP forward. x: (batch, input_dim). params: (w0,b0,w1,b1,w2,b2) with
    weights in (in_features, out_features) layout (transposed vs PyTorch)."""
    w0, b0, w1, b1, w2, b2 = params
    batch, input_dim = x.shape
    l0 = w0.shape[1]
    l1 = w1.shape[1]
    assert w0.shape[0] == input_dim and w1.shape[0] == l0
    assert w2.shape == (l1, 1), "last layer must have a single output"
    # Slab packing puts the contracted dims (input_dim, l0) on the 128-lane axis.
    assert input_dim <= LANES and l0 <= LANES and l1 <= LANES, (
        "slab packing assumes input_dim, layer0, layer1 <= 128")
    # TODO(synk): tile the contraction (K) dimension in the slab for input_dim > 128.

    # ---- pack all weights/biases into one lane-aligned f32 slab (single DMA) -------
    # Every tensor starts on an 8-row boundary so in-kernel slices are tile-aligned.
    r_w0 = 0                          # rows [r_w0, +l0): W0^T  (l0, input_dim)
    r_w1 = r_w0 + _round_up(l0, 8)    # rows [r_w1, +l1): W1^T  (l1, l0)
    r_b0 = r_w1 + _round_up(l1, 8)    # rows [r_b0, +l0): b0 column (l0, 1)
    r_b1 = r_b0 + _round_up(l0, 8)    # rows [r_b1, +l1): b1 column (l1, 1)
    r_w2 = r_b1 + _round_up(l1, 8)    # rows [r_w2, +l1): w2 column (l1, 1)
    r_b2 = r_w2 + _round_up(l1, 8)    # row   r_b2, col 0: b2 scalar
    R = r_b2 + 8                      # sublane-aligned slab height

    slab = jnp.zeros((R, LANES), jnp.float32)
    slab = slab.at[r_w0:r_w0 + l0, :input_dim].set(w0.T.astype(jnp.float32))
    slab = slab.at[r_w1:r_w1 + l1, :l0].set(w1.T.astype(jnp.float32))
    slab = slab.at[r_b0:r_b0 + l0, 0].set(b0.reshape(-1).astype(jnp.float32))
    slab = slab.at[r_b1:r_b1 + l1, 0].set(b1.reshape(-1).astype(jnp.float32))
    slab = slab.at[r_w2:r_w2 + l1, 0].set(w2.reshape(-1).astype(jnp.float32))
    slab = slab.at[r_b2, 0].set(b2.reshape(-1)[0].astype(jnp.float32))

    # ---- stream x at reduced precision (f32 accumulation stays on the MXU) ---------
    # NOTE: callers that already hold bf16 activations avoid this extra cast pass.
    if stream_dtype is not None and x.dtype != stream_dtype:
        x = x.astype(stream_dtype)
    itemsize = jnp.dtype(x.dtype).itemsize

    # ---- batch tile = lane axis of the transposed dataflow -------------------------
    # VMEM per batch row: double-buffered x tile + f32 cast/transposed copies,
    # transposed activations h0/h1/y, double-buffered f32 output row.
    bytes_per_row = (2 * input_dim * itemsize + 2 * input_dim * 4
                     + (l0 + l1 + 1) * 4 + 2 * 4)
    vmem_budget = 12 * 1024 * 1024  # safe on v5e/v6e (128 MiB) and v7x (64 MiB)
    tb = min(block_rows, _round_up(batch, 8), vmem_budget // bytes_per_row)
    tb = max(8, (tb // 128) * 128 if tb >= 128 else (tb // 8) * 8)
    # Keep >= 2 grid tiles for v7x's two TensorCores once the batch is big enough.
    if batch > 256 and pl.cdiv(batch, tb) < 2:
        tb = _round_up(pl.cdiv(batch, 2), 128)
    num_tiles = pl.cdiv(batch, tb)  # ragged last tile handled by Pallas (no jnp.pad)

    def kernel(x_ref, p_ref, o_ref):
        xf = x_ref[...].astype(jnp.float32)              # (TB, input_dim), VPU cast
        w0t = p_ref[r_w0:r_w0 + l0, 0:input_dim]         # (l0, input_dim)
        w1t = p_ref[r_w1:r_w1 + l1, 0:l0]                # (l1, l0)
        b0c = p_ref[r_b0:r_b0 + l0, 0:1]                 # (l0, 1)
        b1c = p_ref[r_b1:r_b1 + l1, 0:1]                 # (l1, 1)
        w2c = p_ref[r_w2:r_w2 + l1, 0:1]                 # (l1, 1)
        b2s = p_ref[r_b2:r_b2 + 1, 0:1]                  # (1, 1)

        # Layer 0: h0^T = W0^T @ x^T  (NT dot_general; batch dense on lanes).
        h0 = lax.dot_general(w0t, xf, (((1,), (1,)), ((), ())),
                             preferred_element_type=jnp.float32)   # (l0, TB)
        h0 = jnp.maximum(h0 + b0c, 0.0)
        # Layer 1: h1^T = W1^T @ h0^T (MXU, f32 accumulation).
        h1 = jnp.dot(w1t, h0, preferred_element_type=jnp.float32)  # (l1, TB)
        h1 = jnp.maximum(h1 + b1c, 0.0)
        # Layer 2 (out_features=1): VPU multiply + sublane reduction -> lane-dense row.
        y = jnp.sum(h1 * w2c, axis=0, keepdims=True) + b2s         # (1, TB)
        o_ref[...] = y.astype(o_ref.dtype)

    out = pl.pallas_call(
        kernel,
        out_shape=jax.ShapeDtypeStruct((num_tiles, 1, tb), jnp.float32),
        grid=(num_tiles,),
        in_specs=[
            # x tile streams with the grid -> double-buffered prefetch.
            pl.BlockSpec((tb, input_dim), lambda i: (i, 0)),
            # constant block index -> fetched once, stays VMEM-resident.
            pl.BlockSpec((R, LANES), lambda i: (0, 0)),
        ],
        # lane-dense (1, TB) output row per grid step.
        out_specs=pl.BlockSpec((None, 1, tb), lambda i: (i, 0, 0)),
        compiler_params=pltpu.CompilerParams(
            dimension_semantics=("parallel",),        # megacore sharding on v7x
            vmem_limit_bytes=32 * 1024 * 1024,
        ),
        cost_estimate=pl.CostEstimate(
            flops=2 * batch * (input_dim * l0 + l0 * l1 + l1),
            transcendentals=0,
            bytes_accessed=x.size * itemsize + slab.size * 4 + batch * 4,
        ),
    )(x, slab)

    return out.reshape(-1)[:batch].reshape(batch, 1)


def init_params(key, input_dim, layer0=16, layer1=8):
    # Deterministic init mimicking PyTorch Linear's U(-1/sqrt(fan_in), 1/sqrt(fan_in)).
    ks = jax.random.split(key, 6)

    def lin(kw, kb, fan_in, fan_out):
        bound = 1.0 / jnp.sqrt(jnp.float32(fan_in))
        w = jax.random.uniform(kw, (fan_in, fan_out), jnp.float32, -bound, bound)
        b = jax.random.uniform(kb, (1, fan_out), jnp.float32, -bound, bound)
        return w, b

    w0, b0 = lin(ks[0], ks[1], input_dim, layer0)
    w1, b1 = lin(ks[2], ks[3], layer0, layer1)
    w2, b2 = lin(ks[4], ks[5], layer1, 1)
    return (w0, b0, w1, b1, w2, b2)


def reference_forward(x, params):
    # True-f32 reference (HIGHEST precision so the comparison isolates the kernel).
    w0, b0, w1, b1, w2, b2 = params
    hi = lax.Precision.HIGHEST
    h0 = jnp.maximum(jnp.dot(x, w0, precision=hi) + b0, 0.0)
    h1 = jnp.maximum(jnp.dot(h0, w1, precision=hi) + b1, 0.0)
    return jnp.dot(h1, w2, precision=hi) + b2


if __name__ == "__main__":
    key = jax.random.PRNGKey(0)
    k_x, k_p, k_x2 = jax.random.split(key, 3)

    batch, input_dim = 8, 32
    x = jax.random.normal(k_x, (batch, input_dim), jnp.float32)
    params = init_params(k_p, input_dim, layer0=16, layer1=8)

    # x is streamed as bf16, so compare against the reference on bf16-rounded inputs.
    def bf16_round(a):
        return a.astype(jnp.bfloat16).astype(jnp.float32)

    # 1) single-tile path
    out = jax.block_until_ready(simple_model_forward(x, params))
    ref = reference_forward(bf16_round(x), params)
    assert out.shape == (batch, 1)
    assert jnp.allclose(out, ref, atol=5e-4, rtol=5e-4), "mismatch vs JAX reference"

    # 2) multi-tile grid path with a ragged last tile (no wrapper-side padding of x)
    batch2 = 300
    x2 = jax.random.normal(k_x2, (batch2, input_dim), jnp.float32)
    out2 = jax.block_until_ready(simple_model_forward(x2, params, block_rows=128))
    ref2 = reference_forward(bf16_round(x2), params)
    assert out2.shape == (batch2, 1)
    assert jnp.allclose(out2, ref2, atol=5e-4, rtol=5e-4), "mismatch vs JAX reference (tiled)"

    print("KERNEL_OK")
</pallas_src>

<mosaic_0001>
module attributes {stable_mosaic.version = 11 : i64} {
  func.func @kernel(%arg0: i32, %arg1: memref<8x32xbf16, #tpu.memory_space<vmem>>, %arg2: memref<64x128xf32, #tpu.memory_space<vmem>>, %arg3: memref<1x1x8xf32, #tpu.memory_space<vmem>>) attributes {dimension_semantics = [#tpu.dimension_semantics<parallel>], iteration_bounds = array<i64: 1>, scalar_prefetch = 0 : i64, scratch_operands = 0 : i64, tpu.core_type = #tpu.core_type<tc>, window_params = [{transform_indices = @transform_0, window_bounds = array<i64: 8, 32>}, {pipeline_mode = #tpu.pipeline_mode<synchronous>, transform_indices = @transform_1, window_bounds = array<i64: 64, 128>}, {transform_indices = @transform_2, window_bounds = array<i64: 1, 1, 8>}]} {
    %c0 = arith.constant 0 : index
    %c0_0 = arith.constant 0 : index
    %0 = vector.load %arg1[%c0, %c0_0] : memref<8x32xbf16, #tpu.memory_space<vmem>>, vector<8x32xbf16>
    %1 = arith.extf %0 : vector<8x32xbf16> to vector<8x32xf32>
    %c0_1 = arith.constant 0 : index
    %c0_2 = arith.constant 0 : index
    %2 = vector.load %arg2[%c0_1, %c0_2] : memref<64x128xf32, #tpu.memory_space<vmem>>, vector<16x32xf32>
    %c16 = arith.constant 16 : index
    %c0_3 = arith.constant 0 : index
    %3 = vector.load %arg2[%c16, %c0_3] : memref<64x128xf32, #tpu.memory_space<vmem>>, vector<8x16xf32>
    %c24 = arith.constant 24 : index
    %c0_4 = arith.constant 0 : index
    %4 = vector.load %arg2[%c24, %c0_4] : memref<64x128xf32, #tpu.memory_space<vmem>>, vector<16x1xf32>
    %c40 = arith.constant 40 : index
    %c0_5 = arith.constant 0 : index
    %5 = vector.load %arg2[%c40, %c0_5] : memref<64x128xf32, #tpu.memory_space<vmem>>, vector<8x1xf32>
    %c48 = arith.constant 48 : index
    %c0_6 = arith.constant 0 : index
    %6 = vector.load %arg2[%c48, %c0_6] : memref<64x128xf32, #tpu.memory_space<vmem>>, vector<8x1xf32>
    %c56 = arith.constant 56 : index
    %c0_7 = arith.constant 0 : index
    %7 = vector.load %arg2[%c56, %c0_7] : memref<64x128xf32, #tpu.memory_space<vmem>>, vector<1x1xf32>
    %cst = arith.constant dense<0.000000e+00> : vector<16x8xf32>
    %8 = tpu.matmul %2, %1, %cst {dimension_numbers = #tpu.dot_dimension_numbers<[1], [1], [0], [0], [0, 0, 1, 0], [], []>} : vector<16x32xf32>, vector<8x32xf32>, vector<16x8xf32> -> vector<16x8xf32>
    %9 = vector.broadcast %4 : vector<16x1xf32> to vector<16x8xf32>
    %10 = arith.addf %8, %9 : vector<16x8xf32>
    %cst_8 = arith.constant 0.000000e+00 : f32
    %11 = vector.broadcast %cst_8 : f32 to vector<16x8xf32>
    %12 = arith.maximumf %10, %11 : vector<16x8xf32>
    %cst_9 = arith.constant dense<0.000000e+00> : vector<8x8xf32>
    %13 = tpu.matmul %3, %12, %cst_9 {dimension_numbers = #tpu.dot_dimension_numbers<[1], [0], [0], [1], [0, 0, 1, 1], [], []>} : vector<8x16xf32>, vector<16x8xf32>, vector<8x8xf32> -> vector<8x8xf32>
    %14 = vector.broadcast %5 : vector<8x1xf32> to vector<8x8xf32>
    %15 = arith.addf %13, %14 : vector<8x8xf32>
    %cst_10 = arith.constant 0.000000e+00 : f32
    %16 = vector.broadcast %cst_10 : f32 to vector<8x8xf32>
    %17 = arith.maximumf %15, %16 : vector<8x8xf32>
    %18 = vector.broadcast %6 : vector<8x1xf32> to vector<8x8xf32>
    %19 = arith.mulf %17, %18 : vector<8x8xf32>
    %cst_11 = arith.constant dense<0.000000e+00> : vector<8xf32>
    %20 = vector.multi_reduction <add>, %19, %cst_11 [0] : vector<8x8xf32> to vector<8xf32>
    %21 = vector.shape_cast %20 : vector<8xf32> to vector<1x8xf32>
    %22 = vector.broadcast %7 : vector<1x1xf32> to vector<1x8xf32>
    %23 = arith.addf %21, %22 : vector<1x8xf32>
    %c0_12 = arith.constant 0 : index
    %c0_13 = arith.constant 0 : index
    %c0_14 = arith.constant 0 : index
    %24 = vector.load %arg3[%c0_12, %c0_13, %c0_14] : memref<1x1x8xf32, #tpu.memory_space<vmem>>, vector<1x1x8xf32>
    %25 = vector.shape_cast %24 : vector<1x1x8xf32> to vector<1x8xf32>
    %26 = vector.shape_cast %23 : vector<1x8xf32> to vector<1x1x8xf32>
    tpu.vector_store %arg3[%c0_12, %c0_13, %c0_14], %26 {strides = array<i32>} : memref<1x1x8xf32, #tpu.memory_space<vmem>>, vector<1x1x8xf32>,
    return
  }
  func.func @transform_0(%arg0: i32) -> (i32, i32) {
    %c0_i32 = arith.constant 0 : i32
    %c0_i32_0 = arith.constant 0 : i32
    return %arg0, %c0_i32 : i32, i32
  }
  func.func @transform_1(%arg0: i32) -> (i32, i32) {
    %c0_i32 = arith.constant 0 : i32
    %c0_i32_0 = arith.constant 0 : i32
    %c0_i32_1 = arith.constant 0 : i32
    return %c0_i32, %c0_i32_0 : i32, i32
  }
  func.func @transform_2(%arg0: i32) -> (i32, i32, i32) {
    %c0_i32 = arith.constant 0 : i32
    %c0_i32_0 = arith.constant 0 : i32
    %c0_i32_1 = arith.constant 0 : i32
    return %arg0, %c0_i32, %c0_i32_0 : i32, i32, i32
  }
}

</mosaic_0001>

<bundles_post_ra>
// kernel: tpu_custom_call.1
= control target key start
LH: loop header
LB: loop body
LE: loop exit
PB: predicated region body
PF: predicated region fallthrough
CT: control target
= control target key end

     0   :  { %7 = vsyncpa [#allocation3], 0  ;;  %s438_s0 = inlined_call_operand.hbm [shape: bf16[8,32], index: 0, kind: input, shape index: {}]   ;;  %s439_s1 = inlined_call_operand.hbm [shape: f32[64,128], index: 1, kind: input, shape index: {}]   ;;  %s440_s2 = inlined_call_operand.hbm [shape: f32[1,1,8], index: 2, kind: output, shape index: {}]  }
   0x1   :  { %8 = vsyncpa [#allocation6], 0 }
   0x2   :  { %9 = vsyncpa [#allocation4], 0  ;;  %s371_s9 = smov [#allocation2]   ;;  %s372_s11 = smov [#allocation5]  }
   0x3   :  { %s16_s10 = sshll.u32 %s371_s9, 4  ;;  %s25_s12 = sshll.u32 %s372_s11, 4  ;;  %s17_s10 = int_to_ptr.vmem [resolvable:$true] %s16_s10  ;;  %s395_s12 = int_to_ptr.vmem [resolvable:$true] %s25_s12 }
   0x4   :  { %s299_s15 = scalar_lea.hbm %s438_s0, 64 }
   0x5   :  { %p300_p0 = scmp.ne.s32.totalorder %s438_s0, %s299_s15  ;;  %p303_p1 = scmp.lt.u32.totalorder %s299_s15, %s438_s0 }
   0x7   :  { %p305_p2 = pnand %p303_p1, %p300_p0 }
   0x9   :  { %308 = shalt.err (!%p305_p2)
}
   0xa   :  { %s309_s20 = scalar_lea.vmem %s17_s10, 64  ;;  %p314_p4 = scmp.lt.s32.totalorder %s17_s10, %s17_s10 }
   0xb   :  { %p310_p3 = scmp.ne.s32.totalorder %s17_s10, %s309_s20  ;;  %p315_p5 = scmp.lt.s32.totalorder %s309_s20, %s309_s20 }
   0xd   :  { %p316_p6 = por %p315_p5, %p314_p4 }
   0xf   :  { %p317_p7 = pnand %p316_p6, %p310_p3 }
  0x11   :  { %320 = shalt.err (!%p317_p7)
}
  0x12   :  { %19 = dma.hbm_to_vmem [thread:$0]  %s438_s0, 64, %s17_s10, [#allocation3]  }
  0x13   :  { %s321_s25 = scalar_lea.hbm %s439_s1, 1024 }
  0x14   :  { %p322_p8 = scmp.ne.s32.totalorder %s439_s1, %s321_s25  ;;  %p325_p9 = scmp.lt.u32.totalorder %s321_s25, %s439_s1 }
  0x16   :  { %p327_p10 = pnand %p325_p9, %p322_p8 }
  0x18   :  { %330 = shalt.err (!%p327_p10)
}
  0x19   :  { %s331_s30 = scalar_lea.vmem %s395_s12, 1024  ;;  %p336_p12 = scmp.lt.s32.totalorder %s395_s12, %s395_s12 }
  0x1a   :  { %p332_p11 = scmp.ne.s32.totalorder %s395_s12, %s331_s30  ;;  %p337_p13 = scmp.lt.s32.totalorder %s331_s30, %s331_s30 }
  0x1c   :  { %p338_p0 = por %p337_p13, %p336_p12 }
  0x1e   :  { %p339_p1 = pnand %p338_p0, %p332_p11 }
  0x20   :  { %342 = shalt.err (!%p339_p1)
}
  0x21   :  { %s373_s0 = smov 128   ;;  %s374_s3 = smov 8  }
  0x22   :  { %31 = dma.hbm_to_vmem [thread:$0]  %s439_s1, 1024, %s395_s12, [#allocation6], %s373_s0, %s373_s0, %s374_s3  }
  0x23   :  { %365 = dma.done.wait [#allocation3], 64  }
  0x24   :  { %366 = vsyncadd [#allocation3], 4294967232 }
  0x25   :  { %367 = dma.done.wait [#allocation6], 1024  }
  0x26   :  { %368 = vsyncadd [#allocation6], 4294966272  ;;  %v375_v0 = vmov 0   ;;  %v38_v1 = vld [vmem:[#allocation2] sm:$0xf]  ;;  %vm58_vm0 = vcmask 261120  }
  0x27   :  { %297 = vset.pattern.permute.xlu0 %v375_v0  ;;  %298 = vset.pattern.permute.xlu1 %v375_v0  ;;  %v40_v2 = vld [vmem:[#allocation5] sm:$0xff]  ;;  %v39_v3 = vunpack.c.l.bf16 %v38_v1  ;;  %v43_v4 = vld [vmem:[#allocation5 + $0x18] sm:$0xff]  ;;  %v41_v6 = vld [vmem:[#allocation5 + $0x8] sm:$0xff]  ;;  %v376_v8 = vmov 0.0|0.0   ;;  %vm377_vm1 = vmmov 0   ;;  %v378_v9 = vmov 0.0  }
  0x28   :  { %275 = vmatprep.mubr.msk.f32.mxu0 %vm58_vm0, %v40_v2  ;;  %50 = vperm.xlu0 %297, %v43_v4   ;;  %v44_v5 = vld [vmem:[#allocation5 + $0x20] sm:$0xff]  ;;  %v47_v7 = vld [vmem:[#allocation5 + $0x38] sm:$0x1]  ;;  %v45_v10 = vld [vmem:[#allocation5 + $0x28] sm:$0xff]  ;;  %vm150_vm2 = vcmask 130048   ;;  %vm231_vm3 = vcmask 64512  }
  0x29   :  { %273 = vmatprep.subr.msk.mxu0 %vm58_vm0, %v39_v3  ;;  %285 = vmatprep.subr.bf16.mxu1 %v376_v8  ;;  %v46_v11 = vld [vmem:[#allocation5 + $0x30] sm:$0xff]  ;;  %s379_s1 = smov [#allocation7]   ;;  %vm245_vm4 = vcmask 57344  }
  0x2a   :  { %274 = vmatpush3.xpose.msk.msra.mxu0 %vm58_vm0, %v39_v3  ;;  %282 = vmatprep.mubr.msk.f32.mxu1 %vm377_vm1, %v378_v9  ;;  %v42_v21 = vld [vmem:[#allocation5 + $0x10] sm:$0xff]  ;;  %s253_s6 = sshll.u32 %s379_s1, 4  ;;  %s254_s6 = int_to_ptr.vmem [resolvable:$true] %s253_s6 }
  0x2b   :  { %147 = vperm.xlu1 %298, %v45_v10   ;;  %s343_s7 = scalar_lea.vmem %s254_s6, 16  ;;  %s347_s8 = scalar_lea.vmem %s254_s6, 32 }
  0x2c   :  { %55 = vperm.xlu0 %297, %v44_v5   ;;  %p344_p2 = scmp.ne.s32.totalorder %s254_s6, %s343_s7  ;;  %p348_p3 = scmp.lt.s32.totalorder %s254_s6, %s254_s6 }
  0x2d   :  { %276 = vmatmul.mubr.msk.f32.vlgmr.msra.gmra.mrb[0].mxu0 %vm58_vm0, %v41_v6  ;;  %p349_p4 = scmp.lt.s32.totalorder %s347_s8, %s343_s7 }
  0x2f   :  { %227 = vperm.xlu1 %298, %v46_v11   ;;  %p350_p5 = por %p349_p4, %p348_p3 }
  0x30   :  { %241 = vperm.xlu0 %297, %v47_v7  }
  0x31   :  { %p351_p6 = pnand %p350_p5, %p344_p2 }
  0xa7   :  { %v51_v12 = vpop.permute.xlu0 %50 }
  0xaa   :  { %v148_v22 = vpop.permute.xlu1 %147 }
  0xab   :  { %v56_v13 = vpop.permute.xlu0 %55 }
  0xae   :  { %v228_v27 = vpop.permute.xlu1 %227 }
  0xaf   :  { %v242_v36 = vpop.permute.xlu0 %241 }
 0x100   :  { %v277_v14 = vpop.f32.mrb[0].mxu0 }
 0x101   :  { %v140_v15 = vadd.f32 %v277_v14, %v56_v13  ;;  %v134_v16 = vpop.f32.mrb[1].mxu0 }
 0x102   :  { %v135_v17 = vadd.f32 %v134_v16, %v51_v12 }
 0x103   :  { %v144_v18 = vmax.f32 %v140_v15, 0.0 }
 0x104   :  { %v143_v19 = vmax.f32 %v135_v17, 0.0 }
 0x106   :  { %v286_v20 = vpack.c.bf16 %v144_v18, %v143_v19 }
 0x108   :  { %287 = vmatpush3.bf16.msra.mxu1 %v286_v20 }
 0x10b   :  { %283 = vmatmul.mubr.msk.f32.vlgmr.msra.gmra.mrb[0].mxu1 %vm150_vm2, %v42_v21 }
 0x1de   :  { %v220_v23 = vpop.f32.mrb[0].mxu1 }
 0x1df   :  { %v221_v24 = vadd.f32 %v220_v23, %v148_v22  ;;  %v284_v25 = vpop.f32.mrb[1].mxu1 }
 0x1e1   :  { %v224_v26 = vmax.f32 %v221_v24, 0.0 }
 0x1e3   :  { %v230_v28 = vmul.f32 %v228_v27, %v224_v26 }
 0x1e5   :  { %v232_v29 = vsel %vm231_vm3, %v230_v28, 0.0 }
 0x1e6   :  { %v233_v30 = vrot.slane %v232_v29, 4 }
 0x1e8   :  { %v234_v31 = vadd.f32 %v233_v30, %v232_v29 }
 0x1ea   :  { %v235_v32 = vrot.slane %v234_v31, 2 }
 0x1ec   :  { %v236_v33 = vadd.f32 %v235_v32, %v234_v31 }
 0x1ee   :  { %v237_v34 = vrot.slane %v236_v33, 1 }
 0x1f0   :  { %v238_v35 = vadd.f32 %v237_v34, %v236_v33 }
 0x1f2   :  { %v244_v37 = vadd.f32 %v242_v36, %v238_v35 }
 0x1f4   :  { %246 = vst.msk [vmem:[#allocation7] sm:$0x1] %vm245_vm4, %v244_v37 }
 0x1f5   :  { %354 = shalt.err (!%p351_p6)
}
 0x1f6   :  { %s355_s11 = scalar_lea.hbm %s440_s2, 16 }
 0x1f7   :  { %p356_p7 = scmp.ne.s32.totalorder %s440_s2, %s355_s11  ;;  %p359_p8 = scmp.lt.u32.totalorder %s355_s11, %s440_s2 }
 0x1f9   :  { %p361_p9 = pnand %p359_p8, %p356_p7 }
 0x1fb   :  { %364 = shalt.err (!%p361_p9)
}
 0x1fc   :  { %256 = dma.vmem_to_hbm [thread:$0]  %s254_s6, 16, %s440_s2, [#allocation4]  }
 0x1fd   :  { %369 = dma.done.wait [#allocation4], 16  }
 0x1fe   :  { %370 = vsyncadd [#allocation4], 4294967280 }
 0x1ff   :  { %260 = vsyncpa [#allocation3], 1 }
 0x200   :  { %261 = vsyncpa [#allocation6], 1 }
 0x201   :  { %262 = vsyncpa [#allocation4], 1 }

</bundles_post_ra>
